<compile_context>
chip_gen: v7x
topology: tpu7x:2x2x1
jax: 0.10.0
libtpu: 0.0.40
codegen_flags: <defaults>
</compile_context>

<pallas_src>
import math
from functools import partial

import jax
import jax.numpy as jnp
from jax.experimental import pallas as pl
from jax.experimental.pallas import tpu as pltpu

EPS_BN = 1e-5
EPS_LN = 1e-5
OUT_LANES = 128  # tiny-batch path: pad the 1-wide output to a full lane group


def _round_up(n, m):
    return (n + m - 1) // m * m


def _gelu_exact(x):
    # exact (erf-based) GELU -- matches torch.nn.GELU() default
    return 0.5 * x * (1.0 + jax.lax.erf(x / jnp.sqrt(jnp.float32(2.0))))


# ----------------------------------------------------------------------------
# weight-slab layouts (row offsets are static Python ints shared by
# fold_params() and the kernel factories)
# ----------------------------------------------------------------------------

def _layout_rowmajor(x_dim, pro_dim, H):
    """Slab for the tiny-batch kernel (batch in sublanes)."""
    Kf, H2, H4 = x_dim + pro_dim, 2 * H, H // 4
    lay, r = {}, 0
    lay["Wf"] = r; r += _round_up(Kf, 8)      # blockdiag(Wx, Wp): (Kf, 2H)
    lay["Wm"] = r; r += _round_up(H2, 8)      # [I; Wv@Wo]:       (2H, H)
    lay["W1"] = r; r += _round_up(H, 8)       # LN-folded:        (H, H/4)
    lay["W2"] = r; r += _round_up(H4, 8)      #                   (H/4, H/16)
    lay["bias"] = r; r += 8                   # bias / w3 / b3 rows
    lay["rows"] = r
    return lay


def _layout_colmajor(x_dim, pro_dim, H):
    """Slab for the large-batch kernel (batch in lanes, transposed weights)."""
    H2, H4, H16 = 2 * H, H // 4, H // 16
    lay, r = {}, 0
    lay["WfT"] = r; r += _round_up(H2, 8)     # (2H, Kf)
    lay["WmT"] = r; r += _round_up(H, 8)      # (H, 2H)
    lay["W1T"] = r; r += _round_up(H4, 8)     # (H/4, H)
    lay["W2T"] = r; r += _round_up(H16, 8)    # (H/16, H/4)
    lay["cols"] = r; r += _round_up(H2, 8)    # bias column block
    lay["rows"] = r
    return lay


# ----------------------------------------------------------------------------
# kernels
# ----------------------------------------------------------------------------

def _make_kernel_rowmajor(x_dim, pro_dim, H):
    """Tiny-batch kernel: activations (B, Kf), batch in sublanes."""
    Kf = x_dim + pro_dim
    H2, H4, H16 = 2 * H, H // 4, H // 16
    lay = _layout_rowmajor(x_dim, pro_dim, H)
    oWf, oWm, oW1, oW2, ob = lay["Wf"], lay["Wm"], lay["W1"], lay["W2"], lay["bias"]
    f32 = jnp.float32

    def kernel(xp_ref, slab_ref, out_ref):
        xp = xp_ref[...]                                     # (B, Kf)
        Wf = slab_ref[oWf:oWf + Kf, 0:H2]
        Wm = slab_ref[oWm:oWm + H2, 0:H]
        W1 = slab_ref[oW1:oW1 + H, 0:H4]
        W2 = slab_ref[oW2:oW2 + H4, 0:H16]
        b_front = slab_ref[ob + 0:ob + 1, 0:H2]
        bvo = slab_ref[ob + 1:ob + 2, 0:H]
        b1 = slab_ref[ob + 2:ob + 3, 0:H4]
        b2 = slab_ref[ob + 3:ob + 4, 0:H16]
        w3r = slab_ref[ob + 4:ob + 5, 0:H16]
        b3row = slab_ref[ob + 5:ob + 6, 0:OUT_LANES]         # b3 pre-broadcast

        # fused front end: [xf | pf] = relu([x | p] @ blockdiag(Wx, Wp) + b)
        a = jnp.maximum(jnp.dot(xp, Wf, preferred_element_type=f32) + b_front, 0.0)
        # seq_len==1 attention + residual in one matmul: fused = xf + pf@(Wv@Wo) + bvo
        fused = jnp.dot(a, Wm, preferred_element_type=f32) + bvo

        # LayerNorm (affine folded into W1/b1)
        mu = jnp.mean(fused, axis=-1, keepdims=True)
        var = jnp.mean((fused - mu) ** 2, axis=-1, keepdims=True)
        h = (fused - mu) * jax.lax.rsqrt(var + EPS_LN)

        h = _gelu_exact(jnp.dot(h, W1, preferred_element_type=f32) + b1)   # (B, H/4)
        h = _gelu_exact(jnp.dot(h, W2, preferred_element_type=f32) + b2)   # (B, H/16)

        # final Linear(H/16 -> 1) on the VPU (no MXU round trip), lane-dense store
        t = jnp.sum(h * w3r, axis=-1, keepdims=True)                        # (B, 1)
        out_ref[...] = jnp.broadcast_to(t, out_ref.shape) + b3row           # (B, 128)

    return kernel


def _make_kernel_colmajor(x_dim, pro_dim, H):
    """Large-batch kernel: activations (Kf, TB), batch in lanes (lane-dense)."""
    Kf = x_dim + pro_dim
    H2, H4, H16 = 2 * H, H // 4, H // 16
    lay = _layout_colmajor(x_dim, pro_dim, H)
    oWf, oWm, oW1, oW2, oc = lay["WfT"], lay["WmT"], lay["W1T"], lay["W2T"], lay["cols"]
    f32 = jnp.float32

    def kernel(xpt_ref, slab_ref, out_ref):
        X = xpt_ref[...]                                     # (Kf, TB)
        WfT = slab_ref[oWf:oWf + H2, 0:Kf]                   # (2H, Kf)
        WmT = slab_ref[oWm:oWm + H, 0:H2]                    # (H, 2H)
        W1T = slab_ref[oW1:oW1 + H4, 0:H]                    # (H/4, H)
        W2T = slab_ref[oW2:oW2 + H16, 0:H4]                  # (H/16, H/4)
        bF = slab_ref[oc:oc + H2, 0:1]                       # bias columns
        bvo = slab_ref[oc:oc + H, 1:2]
        b1 = slab_ref[oc:oc + H4, 2:3]
        b2 = slab_ref[oc:oc + H16, 3:4]
        w3c = slab_ref[oc:oc + H16, 4:5]
        b3 = slab_ref[oc:oc + 1, 5:6]

        a = jnp.maximum(jnp.dot(WfT, X, preferred_element_type=f32) + bF, 0.0)   # (2H, TB)
        fused = jnp.dot(WmT, a, preferred_element_type=f32) + bvo                # (H, TB)

        # LayerNorm over the feature (sublane) axis
        mu = jnp.mean(fused, axis=0, keepdims=True)
        var = jnp.mean((fused - mu) ** 2, axis=0, keepdims=True)
        h = (fused - mu) * jax.lax.rsqrt(var + EPS_LN)

        h = _gelu_exact(jnp.dot(W1T, h, preferred_element_type=f32) + b1)        # (H/4, TB)
        h = _gelu_exact(jnp.dot(W2T, h, preferred_element_type=f32) + b2)        # (H/16, TB)

        # final Linear on VPU + 2-sublane sum; lane-dense (1, TB) store
        out_ref[...] = jnp.sum(h * w3c, axis=0, keepdims=True) + b3

    return kernel


# ----------------------------------------------------------------------------
# parameters (torch-module layout) and one-time host-side folding
# ----------------------------------------------------------------------------

def init_params(key, x_dim, pro_dim, hidden_dim):
    """Synthetic parameters matching the torch module (inference buffers incl.).

    The q/k projections of nn.MultiheadAttention are mathematically irrelevant
    for seq_len==1 (softmax over one key == 1) and are not materialized.
    """
    H = hidden_dim
    ks = jax.random.split(key, 20)

    def kaiming(k, fan_in, fan_out):
        std = math.sqrt(2.0 / fan_in)
        return (std * jax.random.normal(k, (fan_in, fan_out))).astype(jnp.float32)

    def row(v):
        return jnp.asarray(v, jnp.float32).reshape(1, -1)

    p = {}
    # x_mlp: Linear + BatchNorm1d (non-trivial running stats / affine)
    p["wx"] = kaiming(ks[0], x_dim, H)
    p["bx"] = row(jnp.full((H,), 0.1))
    p["bnx_g"] = row(1.0 + 0.1 * jax.random.normal(ks[1], (H,)))
    p["bnx_b"] = row(0.05 * jax.random.normal(ks[2], (H,)))
    p["bnx_m"] = row(0.1 * jax.random.normal(ks[3], (H,)))
    p["bnx_v"] = row(0.5 + jax.random.uniform(ks[4], (H,)))

    # pro_mlp
    p["wp"] = kaiming(ks[5], pro_dim, H)
    p["bp"] = row(jnp.full((H,), 0.1))
    p["bnp_g"] = row(1.0 + 0.1 * jax.random.normal(ks[6], (H,)))
    p["bnp_b"] = row(0.05 * jax.random.normal(ks[7], (H,)))
    p["bnp_m"] = row(0.1 * jax.random.normal(ks[8], (H,)))
    p["bnp_v"] = row(0.5 + jax.random.uniform(ks[9], (H,)))

    # MultiheadAttention: only V / out_proj matter for seq_len==1
    std_attn = math.sqrt(1.0 / H)
    p["wv"] = (std_attn * jax.random.normal(ks[10], (H, H))).astype(jnp.float32)
    p["bv"] = row(jnp.zeros((H,)))
    p["wo"] = (std_attn * jax.random.normal(ks[11], (H, H))).astype(jnp.float32)
    p["bo"] = row(jnp.zeros((H,)))

    # regressor
    p["ln_g"] = row(1.0 + 0.1 * jax.random.normal(ks[12], (H,)))
    p["ln_b"] = row(0.05 * jax.random.normal(ks[13], (H,)))
    p["w1"] = kaiming(ks[14], H, H // 4)
    p["b1"] = row(jnp.full((H // 4,), 0.1))
    p["w2"] = kaiming(ks[15], H // 4, H // 16)
    p["b2"] = row(jnp.full((H // 16,), 0.1))
    p["w3"] = kaiming(ks[16], H // 16, 1)
    p["b3"] = row(jnp.full((1,), 0.1))
    return p


def fold_params(p, x_dim, pro_dim, hidden_dim):
    """One-time folding: BN->Linear, LN-affine->Linear, block-diag front end,
    [I; Wv@Wo] fuse matrix, then pack everything into two lane-padded slabs."""
    H = hidden_dim
    H2, H4, H16 = 2 * H, H // 4, H // 16
    Kf = x_dim + pro_dim

    # BatchNorm(eval) folded into the preceding Linear
    s_x = p["bnx_g"] * jax.lax.rsqrt(p["bnx_v"] + EPS_BN)          # (1, H)
    s_p = p["bnp_g"] * jax.lax.rsqrt(p["bnp_v"] + EPS_BN)
    wx = p["wx"] * s_x
    bx = (p["bx"] - p["bnx_m"]) * s_x + p["bnx_b"]
    wp = p["wp"] * s_p
    bp = (p["bp"] - p["bnp_m"]) * s_p + p["bnp_b"]

    # block-diagonal front-end weight: [x | p] @ Wf = [xf_pre | pf_pre]
    Wf = jnp.zeros((Kf, H2), jnp.float32)
    Wf = Wf.at[:x_dim, :H].set(wx).at[x_dim:, H:].set(wp)
    b_front = jnp.concatenate([bx, bp], axis=1)                     # (1, 2H)

    # seq_len==1 attention + residual: fused = [xf|pf] @ [I; Wv@Wo] + (bv@Wo + bo)
    wvo = p["wv"] @ p["wo"]
    bvo = p["bv"] @ p["wo"] + p["bo"]                               # (1, H)
    Wm = jnp.concatenate([jnp.eye(H, dtype=jnp.float32), wvo], axis=0)   # (2H, H)

    # LayerNorm affine folded into the first regressor Linear
    w1 = p["ln_g"].reshape(-1, 1) * p["w1"]
    b1 = p["ln_b"] @ p["w1"] + p["b1"]
    w2, b2 = p["w2"], p["b2"]
    w3, b3 = p["w3"], p["b3"]                                       # (H16,1), (1,1)

    # ---- row-major slab (tiny-batch kernel) ----
    layA = _layout_rowmajor(x_dim, pro_dim, H)
    lanesA = max(128, _round_up(H2, 128))
    A = jnp.zeros((layA["rows"], lanesA), jnp.float32)
    A = A.at[layA["Wf"]:layA["Wf"] + Kf, :H2].set(Wf)
    A = A.at[layA["Wm"]:layA["Wm"] + H2, :H].set(Wm)
    A = A.at[layA["W1"]:layA["W1"] + H, :H4].set(w1)
    A = A.at[layA["W2"]:layA["W2"] + H4, :H16].set(w2)
    ob = layA["bias"]
    A = A.at[ob + 0, :H2].set(b_front[0])
    A = A.at[ob + 1, :H].set(bvo[0])
    A = A.at[ob + 2, :H4].set(b1[0])
    A = A.at[ob + 3, :H16].set(b2[0])
    A = A.at[ob + 4, :H16].set(w3[:, 0])
    A = A.at[ob + 5, :OUT_LANES].set(jnp.full((OUT_LANES,), b3[0, 0]))

    # ---- col-major slab (large-batch transposed kernel) ----
    layB = _layout_colmajor(x_dim, pro_dim, H)
    lanesB = max(128, _round_up(max(Kf, H2), 128))
    C = jnp.zeros((layB["rows"], lanesB), jnp.float32)
    C = C.at[layB["WfT"]:layB["WfT"] + H2, :Kf].set(Wf.T)
    C = C.at[layB["WmT"]:layB["WmT"] + H, :H2].set(Wm.T)
    C = C.at[layB["W1T"]:layB["W1T"] + H4, :H].set(w1.T)
    C = C.at[layB["W2T"]:layB["W2T"] + H16, :H4].set(w2.T)
    oc = layB["cols"]
    C = C.at[oc:oc + H2, 0].set(b_front[0])
    C = C.at[oc:oc + H, 1].set(bvo[0])
    C = C.at[oc:oc + H4, 2].set(b1[0])
    C = C.at[oc:oc + H16, 3].set(b2[0])
    C = C.at[oc:oc + H16, 4].set(w3[:, 0])
    C = C.at[oc, 5].set(b3[0, 0])

    return {"slab_row": A, "slab_col": C}


def default_batch_tile(batch, num_cores=1):
    """Grid policy per review: grid-less on single-TC chips (v5e/v6e); on v7x
    (2 TCs) pick a lane-aligned tile so the parallel grid has exactly 2 steps."""
    if num_cores <= 1 or batch < 256:
        return None
    return max(128, _round_up(-(-batch // num_cores), 128))


# ----------------------------------------------------------------------------
# pallas_call wrapper
# ----------------------------------------------------------------------------

@partial(jax.jit, static_argnames=("hidden_dim", "batch_tile"))
def cross_attention_regressor(x_embed, pro_embed, slabs, *, hidden_dim, batch_tile=None):
    B, x_dim = x_embed.shape
    pro_dim = pro_embed.shape[1]
    H = hidden_dim
    Kf = x_dim + pro_dim

    # fused front-end input [x | p] (cheap XLA concat; replaces one DMA stream)
    xp = jnp.concatenate([x_embed, pro_embed], axis=1).astype(jnp.float32)   # (B, Kf)

    flops = 2 * B * (Kf * 2 * H + 2 * H * H + H * (H // 4)
                     + (H // 4) * (H // 16) + (H // 16))
    transcendentals = B * (H // 4 + H // 16)

    if batch_tile is None:
        # Tiny-batch path: single grid-less invocation, everything resident in VMEM.
        slab = slabs["slab_row"]
        kernel = _make_kernel_rowmajor(x_dim, pro_dim, H)
        vmem = pl.BlockSpec(memory_space=pltpu.MemorySpace.VMEM)
        out = pl.pallas_call(
            kernel,
            out_shape=jax.ShapeDtypeStruct((B, OUT_LANES), jnp.float32),
            in_specs=[vmem, vmem],
            out_specs=vmem,
            cost_estimate=pl.CostEstimate(
                flops=flops, transcendentals=transcendentals,
                bytes_accessed=4 * (xp.size + slab.size + B * OUT_LANES)),
        )(xp, slab)
        return out[:, 0]                                   # .squeeze(-1) -> (B,)

    # Large-batch path: batch-in-lanes (transposed) kernel, 1-D parallel grid.
    TB = batch_tile
    if TB % 128 != 0 and TB != B:
        raise ValueError("batch_tile must be a multiple of 128 (or equal to batch)")
    slab = slabs["slab_col"]
    kernel = _make_kernel_colmajor(x_dim, pro_dim, H)
    xpt = xp.T                                             # (Kf, B) -- XLA transpose
    out = pl.pallas_call(
        kernel,
        out_shape=jax.ShapeDtypeStruct((1, B), jnp.float32),
        grid=(pl.cdiv(B, TB),),
        in_specs=[
            pl.BlockSpec((Kf, TB), lambda i: (0, i)),
            pl.BlockSpec(slab.shape, lambda i: (0, 0)),    # weights stay resident
        ],
        out_specs=pl.BlockSpec((1, TB), lambda i: (0, i)),
        compiler_params=pltpu.CompilerParams(dimension_semantics=("parallel",)),
        cost_estimate=pl.CostEstimate(
            flops=flops, transcendentals=transcendentals,
            bytes_accessed=4 * (xpt.size + slab.size + B)),
    )(xpt, slab)
    return out[0]                                          # (B,)


# ----------------------------------------------------------------------------
# pure-JAX reference (un-folded params, same inference semantics)
# ----------------------------------------------------------------------------

def reference_forward(x_embed, pro_embed, p):
    xf = x_embed @ p["wx"] + p["bx"]
    xf = (xf - p["bnx_m"]) / jnp.sqrt(p["bnx_v"] + EPS_BN) * p["bnx_g"] + p["bnx_b"]
    xf = jnp.maximum(xf, 0.0)
    pf = pro_embed @ p["wp"] + p["bp"]
    pf = (pf - p["bnp_m"]) / jnp.sqrt(p["bnp_v"] + EPS_BN) * p["bnp_g"] + p["bnp_b"]
    pf = jnp.maximum(pf, 0.0)
    # seq_len == 1 attention: softmax over one key == 1 -> attn = out_proj(V)
    v = pf @ p["wv"] + p["bv"]
    attn_out = v @ p["wo"] + p["bo"]
    fused = xf + attn_out
    mu = fused.mean(-1, keepdims=True)
    var = ((fused - mu) ** 2).mean(-1, keepdims=True)
    h = (fused - mu) / jnp.sqrt(var + EPS_LN) * p["ln_g"] + p["ln_b"]
    h = jax.nn.gelu(h @ p["w1"] + p["b1"], approximate=False)
    h = jax.nn.gelu(h @ p["w2"] + p["b2"], approximate=False)
    return (h @ p["w3"] + p["b3"])[:, 0]


if __name__ == "__main__":
    B, X_DIM, PRO_DIM, HIDDEN = 8, 48, 40, 32   # hidden=32 -> 8 heads of dim 4

    key = jax.random.PRNGKey(0)
    kx, kp, kw = jax.random.split(key, 3)
    x_embed = jax.random.normal(kx, (B, X_DIM), dtype=jnp.float32)
    pro_embed = jax.random.normal(kp, (B, PRO_DIM), dtype=jnp.float32)

    params = init_params(kw, X_DIM, PRO_DIM, HIDDEN)
    slabs = fold_params(params, X_DIM, PRO_DIM, HIDDEN)   # one-time, off hot path

    # --- tiny batch: grid-less invocation (v5e/v6e default) ---
    out = cross_attention_regressor(x_embed, pro_embed, slabs, hidden_dim=HIDDEN)
    out = jax.block_until_ready(out)
    ref = reference_forward(x_embed, pro_embed, params)
    assert out.shape == (B,)
    assert bool(jnp.all(jnp.isfinite(out)))
    assert bool(jnp.allclose(out, ref, atol=1e-4, rtol=1e-4)), (out, ref)

    # --- large batch: 2-step parallel grid, batch-in-lanes kernel (v7x megacore) ---
    BL = 512
    TB = default_batch_tile(BL, num_cores=2)    # -> 256, exactly 2 grid steps
    kx2, kp2 = jax.random.split(jax.random.PRNGKey(1), 2)
    x_l = jax.random.normal(kx2, (BL, X_DIM), dtype=jnp.float32)
    p_l = jax.random.normal(kp2, (BL, PRO_DIM), dtype=jnp.float32)
    out_l = cross_attention_regressor(x_l, p_l, slabs, hidden_dim=HIDDEN, batch_tile=TB)
    out_l = jax.block_until_ready(out_l)
    ref_l = reference_forward(x_l, p_l, params)
    assert out_l.shape == (BL,)
    assert bool(jnp.all(jnp.isfinite(out_l)))
    assert bool(jnp.allclose(out_l, ref_l, atol=1e-4, rtol=1e-4))

    print("KERNEL_OK")
</pallas_src>

<mosaic_0001>
module attributes {stable_mosaic.version = 11 : i64} {
  func.func @kernel(%arg0: memref<8x88xf32, #tpu.memory_space<vmem>>, %arg1: memref<200x128xf32, #tpu.memory_space<vmem>>, %arg2: memref<8x128xf32, #tpu.memory_space<vmem>>) attributes {dimension_semantics = [], scalar_prefetch = 0 : i64, scratch_operands = 0 : i64, tpu.core_type = #tpu.core_type<tc>} {
    %c0 = arith.constant 0 : index
    %c0_0 = arith.constant 0 : index
    %0 = vector.load %arg0[%c0, %c0_0] : memref<8x88xf32, #tpu.memory_space<vmem>>, vector<8x88xf32>
    %c0_1 = arith.constant 0 : index
    %c0_2 = arith.constant 0 : index
    %1 = vector.load %arg1[%c0_1, %c0_2] : memref<200x128xf32, #tpu.memory_space<vmem>>, vector<88x64xf32>
    %c88 = arith.constant 88 : index
    %c0_3 = arith.constant 0 : index
    %2 = vector.load %arg1[%c88, %c0_3] : memref<200x128xf32, #tpu.memory_space<vmem>>, vector<64x32xf32>
    %c152 = arith.constant 152 : index
    %c0_4 = arith.constant 0 : index
    %3 = vector.load %arg1[%c152, %c0_4] : memref<200x128xf32, #tpu.memory_space<vmem>>, vector<32x8xf32>
    %c184 = arith.constant 184 : index
    %c0_5 = arith.constant 0 : index
    %4 = vector.load %arg1[%c184, %c0_5] : memref<200x128xf32, #tpu.memory_space<vmem>>, vector<8x2xf32>
    %c192 = arith.constant 192 : index
    %c0_6 = arith.constant 0 : index
    %5 = vector.load %arg1[%c192, %c0_6] : memref<200x128xf32, #tpu.memory_space<vmem>>, vector<1x64xf32>
    %c193 = arith.constant 193 : index
    %c0_7 = arith.constant 0 : index
    %6 = vector.load %arg1[%c193, %c0_7] : memref<200x128xf32, #tpu.memory_space<vmem>>, vector<1x32xf32>
    %c194 = arith.constant 194 : index
    %c0_8 = arith.constant 0 : index
    %7 = vector.load %arg1[%c194, %c0_8] : memref<200x128xf32, #tpu.memory_space<vmem>>, vector<1x8xf32>
    %c195 = arith.constant 195 : index
    %c0_9 = arith.constant 0 : index
    %8 = vector.load %arg1[%c195, %c0_9] : memref<200x128xf32, #tpu.memory_space<vmem>>, vector<1x2xf32>
    %c196 = arith.constant 196 : index
    %c0_10 = arith.constant 0 : index
    %9 = vector.load %arg1[%c196, %c0_10] : memref<200x128xf32, #tpu.memory_space<vmem>>, vector<1x2xf32>
    %c197 = arith.constant 197 : index
    %c0_11 = arith.constant 0 : index
    %10 = vector.load %arg1[%c197, %c0_11] : memref<200x128xf32, #tpu.memory_space<vmem>>, vector<1x128xf32>
    %cst = arith.constant dense<0.000000e+00> : vector<8x64xf32>
    %11 = tpu.matmul %0, %1, %cst {dimension_numbers = #tpu.dot_dimension_numbers<[1], [0], [0], [1], [0, 0, 1, 1], [], []>} : vector<8x88xf32>, vector<88x64xf32>, vector<8x64xf32> -> vector<8x64xf32>
    %12 = vector.broadcast %5 : vector<1x64xf32> to vector<8x64xf32>
    %13 = arith.addf %11, %12 : vector<8x64xf32>
    %cst_12 = arith.constant 0.000000e+00 : f32
    %14 = vector.broadcast %cst_12 : f32 to vector<8x64xf32>
    %15 = arith.maximumf %13, %14 : vector<8x64xf32>
    %cst_13 = arith.constant dense<0.000000e+00> : vector<8x32xf32>
    %16 = tpu.matmul %15, %2, %cst_13 {dimension_numbers = #tpu.dot_dimension_numbers<[1], [0], [0], [1], [0, 0, 1, 1], [], []>} : vector<8x64xf32>, vector<64x32xf32>, vector<8x32xf32> -> vector<8x32xf32>
    %17 = vector.broadcast %6 : vector<1x32xf32> to vector<8x32xf32>
    %18 = arith.addf %16, %17 : vector<8x32xf32>
    %cst_14 = arith.constant dense<0.000000e+00> : vector<8xf32>
    %19 = vector.multi_reduction <add>, %18, %cst_14 [1] : vector<8x32xf32> to vector<8xf32>
    %20 = vector.shape_cast %19 : vector<8xf32> to vector<8x1xf32>
    %cst_15 = arith.constant 3.200000e+01 : f32
    %21 = vector.broadcast %cst_15 : f32 to vector<8x1xf32>
    %22 = arith.divf %20, %21 : vector<8x1xf32>
    %23 = vector.broadcast %22 : vector<8x1xf32> to vector<8x32xf32>
    %24 = arith.subf %18, %23 : vector<8x32xf32>
    %25 = arith.mulf %24, %24 : vector<8x32xf32>
    %cst_16 = arith.constant dense<0.000000e+00> : vector<8xf32>
    %26 = vector.multi_reduction <add>, %25, %cst_16 [1] : vector<8x32xf32> to vector<8xf32>
    %27 = vector.shape_cast %26 : vector<8xf32> to vector<8x1xf32>
    %cst_17 = arith.constant 3.200000e+01 : f32
    %28 = vector.broadcast %cst_17 : f32 to vector<8x1xf32>
    %29 = arith.divf %27, %28 : vector<8x1xf32>
    %30 = vector.broadcast %22 : vector<8x1xf32> to vector<8x32xf32>
    %31 = arith.subf %18, %30 : vector<8x32xf32>
    %cst_18 = arith.constant 9.99999974E-6 : f32
    %32 = vector.broadcast %cst_18 : f32 to vector<8x1xf32>
    %33 = arith.addf %29, %32 : vector<8x1xf32>
    %34 = math.rsqrt %33 : vector<8x1xf32>
    %35 = vector.broadcast %34 : vector<8x1xf32> to vector<8x32xf32>
    %36 = arith.mulf %31, %35 : vector<8x32xf32>
    %cst_19 = arith.constant dense<0.000000e+00> : vector<8x8xf32>
    %37 = tpu.matmul %36, %3, %cst_19 {dimension_numbers = #tpu.dot_dimension_numbers<[1], [0], [0], [1], [0, 0, 1, 1], [], []>} : vector<8x32xf32>, vector<32x8xf32>, vector<8x8xf32> -> vector<8x8xf32>
    %38 = vector.broadcast %7 : vector<1x8xf32> to vector<8x8xf32>
    %39 = arith.addf %37, %38 : vector<8x8xf32>
    %cst_20 = arith.constant 5.000000e-01 : f32
    %40 = vector.broadcast %cst_20 : f32 to vector<8x8xf32>
    %41 = arith.mulf %40, %39 : vector<8x8xf32>
    %cst_21 = arith.constant 2.000000e+00 : f32
    %42 = math.sqrt %cst_21 : f32
    %43 = vector.broadcast %42 : f32 to vector<8x8xf32>
    %44 = arith.divf %39, %43 : vector<8x8xf32>
    %45 = math.erf %44 : vector<8x8xf32>
    %cst_22 = arith.constant 1.000000e+00 : f32
    %46 = vector.broadcast %cst_22 : f32 to vector<8x8xf32>
    %47 = arith.addf %46, %45 : vector<8x8xf32>
    %48 = arith.mulf %41, %47 : vector<8x8xf32>
    %cst_23 = arith.constant dense<0.000000e+00> : vector<8x2xf32>
    %49 = tpu.matmul %48, %4, %cst_23 {dimension_numbers = #tpu.dot_dimension_numbers<[1], [0], [0], [1], [0, 0, 1, 1], [], []>} : vector<8x8xf32>, vector<8x2xf32>, vector<8x2xf32> -> vector<8x2xf32>
    %50 = vector.broadcast %8 : vector<1x2xf32> to vector<8x2xf32>
    %51 = arith.addf %49, %50 : vector<8x2xf32>
    %cst_24 = arith.constant 5.000000e-01 : f32
    %52 = vector.broadcast %cst_24 : f32 to vector<8x2xf32>
    %53 = arith.mulf %52, %51 : vector<8x2xf32>
    %cst_25 = arith.constant 2.000000e+00 : f32
    %54 = math.sqrt %cst_25 : f32
    %55 = vector.broadcast %54 : f32 to vector<8x2xf32>
    %56 = arith.divf %51, %55 : vector<8x2xf32>
    %57 = math.erf %56 : vector<8x2xf32>
    %cst_26 = arith.constant 1.000000e+00 : f32
    %58 = vector.broadcast %cst_26 : f32 to vector<8x2xf32>
    %59 = arith.addf %58, %57 : vector<8x2xf32>
    %60 = arith.mulf %53, %59 : vector<8x2xf32>
    %61 = vector.broadcast %9 : vector<1x2xf32> to vector<8x2xf32>
    %62 = arith.mulf %60, %61 : vector<8x2xf32>
    %cst_27 = arith.constant dense<0.000000e+00> : vector<8xf32>
    %63 = vector.multi_reduction <add>, %62, %cst_27 [1] : vector<8x2xf32> to vector<8xf32>
    %64 = vector.shape_cast %63 : vector<8xf32> to vector<8x1xf32>
    %65 = vector.shape_cast %64 : vector<8x1xf32> to vector<8x1xf32>
    %66 = vector.broadcast %65 : vector<8x1xf32> to vector<8x128xf32>
    %67 = vector.broadcast %10 : vector<1x128xf32> to vector<8x128xf32>
    %68 = arith.addf %66, %67 : vector<8x128xf32>
    %c0_28 = arith.constant 0 : index
    %c0_29 = arith.constant 0 : index
    %69 = vector.load %arg2[%c0_28, %c0_29] : memref<8x128xf32, #tpu.memory_space<vmem>>, vector<8x128xf32>
    tpu.vector_store %arg2[%c0_28, %c0_29], %68 {strides = array<i32>} : memref<8x128xf32, #tpu.memory_space<vmem>>, vector<8x128xf32>,
    return
  }
}

</mosaic_0001>

<bundles_post_ra>
// kernel: cross_attention_regressor.1
= control target key start
LH: loop header
LB: loop body
LE: loop exit
PB: predicated region body
PF: predicated region fallthrough
CT: control target
= control target key end

     0   :  { %7 = vsyncpa [#allocation3], 0  ;;  %s581_s9 = smov [#allocation2]   ;;  %s644_s0 = inlined_call_operand.vmem [shape: f32[8,88], index: 0, kind: input, shape index: {}]   ;;  %s645_s1 = inlined_call_operand.hbm [shape: f32[200,128], index: 1, kind: input, shape index: {}]   ;;  %s646_s2 = inlined_call_operand.vmem [shape: f32[8,128], index: 2, kind: output, shape index: {}]  }
   0x1   :  { %s15_s10 = sshll.u32 %s581_s9, 4  ;;  %s557_s13 = scalar_lea.hbm %s645_s1, 3200  ;;  %s16_s10 = int_to_ptr.vmem [resolvable:$true] %s15_s10 }
   0x2   :  { %p558_p0 = scmp.ne.s32.totalorder %s645_s1, %s557_s13  ;;  %p561_p1 = scmp.lt.u32.totalorder %s557_s13, %s645_s1 }
   0x4   :  { %p563_p2 = pnand %p561_p1, %p558_p0 }
   0x6   :  { %566 = shalt.err (!%p563_p2)
}
   0x7   :  { %s567_s18 = scalar_lea.vmem %s16_s10, 3200  ;;  %p572_p4 = scmp.lt.s32.totalorder %s16_s10, %s16_s10 }
   0x8   :  { %p568_p3 = scmp.ne.s32.totalorder %s16_s10, %s567_s18  ;;  %p573_p5 = scmp.lt.s32.totalorder %s567_s18, %s567_s18 }
   0xa   :  { %p574_p6 = por %p573_p5, %p572_p4 }
   0xc   :  { %p575_p7 = pnand %p574_p6, %p568_p3 }
   0xe   :  { %578 = shalt.err (!%p575_p7)
}
   0xf   :  { %s582_s19 = smov 128   ;;  %s583_s20 = smov 8  }
  0x10   :  { %21 = dma.hbm_to_vmem [thread:$0]  %s645_s1, 3200, %s16_s10, [#allocation3], %s582_s19, %s582_s19, %s583_s20  }
  0x11   :  { %579 = dma.done.wait [#allocation3], 3200  }
  0x12   :  { %580 = vsyncadd [#allocation3], 4294964096  ;;  %v584_v0 = vmov 0.0|0.0   ;;  %vm585_vm0 = vmmov 0   ;;  %v586_v1 = vmov 0.0   ;;  %v26_v2 = vld [vmem:[#allocation2] sm:$0xff] }
  0x13   :  { %512 = vmatprep.subr.bf16.mxu0 %v584_v0  ;;  %474 = vmatprep.mubr.msk.f32.mxu0 %vm585_vm0, %v586_v1  ;;  %v27_v3 = vld [vmem:[#allocation2 + $0x8] sm:$0xff]  ;;  %v28_v4 = vld [vmem:[#allocation2 + $0x10] sm:$0xff]  ;;  %v29_v6 = vld [vmem:[#allocation2 + $0x18] sm:$0xff]  ;;  %vm60_vm1 = vcmask 719872   ;;  %vm139_vm2 = vcmask 523264   ;;  %vm213_vm3 = vcmask 261120  }
  0x14   :  { %527 = vmatprep.subr.bf16.mxu1 %v584_v0  ;;  %493 = vmatprep.mubr.msk.f32.mxu1 %vm585_vm0, %v586_v1  ;;  %v513_v5 = vpack.c.bf16 %v27_v3, %v26_v2  ;;  %v516_v7 = vpack.c.bf16 %v29_v6, %v28_v4  ;;  %v30_v8 = vld [vmem:[#allocation2 + $0x20] sm:$0xff]  ;;  %v31_v9 = vld [vmem:[#allocation2 + $0x28] sm:$0xff]  ;;  %v37_v10 = vld [vmem:[#allocation2 + $0x58] sm:$0xff]  ;;  %vm315_vm4 = vcmask 64512   ;;  %vm399_vm5 = vcmask 15360  }
  0x15   :  { %v38_v11 = vld [vmem:[#allocation2 + $0x60] sm:$0xff]  ;;  %v39_v12 = vld [vmem:[#allocation2 + $0x68] sm:$0xff]  ;;  %v40_v14 = vld [vmem:[#allocation2 + $0x70] sm:$0xff]  ;;  %v519_v15 = vpack.c.bf16 %v31_v9, %v30_v8 }
  0x16   :  { %514 = vmatpush3.bf16.msra.mxu0 %v513_v5  ;;  %v528_v13 = vpack.c.bf16 %v38_v11, %v37_v10  ;;  %v32_v16 = vld [vmem:[#allocation2 + $0x30] sm:$0xff]  ;;  %v531_v17 = vpack.c.bf16 %v40_v14, %v39_v12  ;;  %v33_v18 = vld [vmem:[#allocation2 + $0x38] sm:$0xff]  ;;  %v42_v20 = vld [vmem:[#allocation2 + $0x80] sm:$0xff] }
  0x17   :  { %515 = vmatprep.subr.bf16.mxu0 %v584_v0  ;;  %v41_v19 = vld [vmem:[#allocation2 + $0x78] sm:$0xff]  ;;  %v522_v21 = vpack.c.bf16 %v33_v18, %v32_v16  ;;  %v34_v23 = vld [vmem:[#allocation2 + $0x40] sm:$0xff]  ;;  %v35_v24 = vld [vmem:[#allocation2 + $0x48] sm:$0xff] }
  0x18   :  { %529 = vmatpush3.bf16.msra.mxu1 %v528_v13  ;;  %v534_v22 = vpack.c.bf16 %v42_v20, %v41_v19  ;;  %v525_v25 = vpack.c.bf16 %v35_v24, %v34_v23  ;;  %v36_v26 = vld [vmem:[#allocation2 + $0x50] sm:$0xff]  ;;  %v25_v27 = vld [vmem:[%s644_s0] sm:$0xff]  ;;  %v43_v28 = vld [vmem:[#allocation2 + $0x88] sm:$0xff] }
  0x19   :  { %530 = vmatprep.subr.bf16.mxu1 %v584_v0  ;;  %v44_v29 = vld [vmem:[#allocation2 + $0x90] sm:$0xff]  ;;  %v414_v31 = vld [vmem:[#allocation2 + $0xc0] ss:$0 sm:$0xff]  ;;  %v416_v36 = vld [vmem:[#allocation2 + $0xc1] ss:$0 sm:$0xff] }
  0x1a   :  { %517 = vmatpush3.bf16.msra.mxu0 %v516_v7  ;;  %v537_v30 = vpack.c.bf16 %v44_v29, %v43_v28  ;;  %v45_v46 = vld [vmem:[#allocation2 + $0x98] sm:$0xff]  ;;  %v46_v47 = vld [vmem:[#allocation2 + $0xa0] sm:$0xff]  ;;  %v47_v49 = vld [vmem:[#allocation2 + $0xa8] sm:$0xff] }
  0x1b   :  { %518 = vmatprep.subr.bf16.mxu0 %v584_v0  ;;  %v540_v48 = vpack.c.bf16 %v46_v47, %v45_v46  ;;  %v48_v50 = vld [vmem:[#allocation2 + $0xb0] sm:$0xff]  ;;  %v49_v57 = vld [vmem:[#allocation2 + $0xb8] sm:$0xff]  ;;  %v418_v58 = vld [vmem:[#allocation2 + $0xc2] ss:$0 sm:$0xff] }
  0x1c   :  { %532 = vmatpush3.bf16.msra.mxu1 %v531_v17  ;;  %v543_v51 = vpack.c.bf16 %v48_v50, %v47_v49  ;;  %v420_v3 = vld [vmem:[#allocation2 + $0xc3] ss:$0 sm:$0xff]  ;;  %v422_v11 = vld [vmem:[#allocation2 + $0xc4] ss:$0 sm:$0xff] }
  0x1d   :  { %533 = vmatprep.subr.bf16.mxu1 %v584_v0 }
  0x1e   :  { %520 = vmatpush3.bf16.msra.mxu0 %v519_v15  ;;  %v423_v15 = vld [vmem:[#allocation2 + $0xc5] ss:$0 sm:$0xff] }
  0x1f   :  { %521 = vmatprep.subr.bf16.mxu0 %v584_v0 }
  0x20   :  { %535 = vmatpush3.bf16.msra.mxu1 %v534_v22 }
  0x21   :  { %536 = vmatprep.subr.bf16.mxu1 %v584_v0 }
  0x22   :  { %523 = vmatpush3.bf16.msra.mxu0 %v522_v21 }
  0x23   :  { %524 = vmatprep.subr.bf16.mxu0 %v584_v0 }
  0x24   :  { %538 = vmatpush3.bf16.msra.mxu1 %v537_v30 }
  0x25   :  { %539 = vmatprep.subr.bf16.mxu1 %v584_v0 }
  0x26   :  { %526 = vmatpush3.bf16.msra.mxu0 %v525_v25 }
  0x27   :  { %472 = vmatprep.subr.mxu0 %v586_v1 }
  0x2a   :  { %473 = vmatpush3.msra.mxu0 %v36_v26 }
  0x2b   :  { %475 = vmatmul.mubr.msk.f32.vlgmr.msra.gmra.mrb[0].mxu0 %vm60_vm1, %v25_v27  ;;  %507 = vmatprep.subr.mxu0 %v586_v1 }
  0x2c   :  { %509 = vmatprep.mubr.msk.f32.mxu0 %vm585_vm0, %v586_v1  ;;  %508 = vmatpush3.msra.mxu0 %v49_v57 }
  0xfe   :  { %v130_v32 = vpop.f32.mrb[0].mxu0 }
  0xff   :  { %v131_v33 = vadd.f32 %v414_v31, %v130_v32  ;;  %v476_v34 = vpop.f32.mrb[1].mxu0 }
 0x101   :  { %v134_v35 = vmax.f32 %v131_v33, 0.0 }
 0x103   :  { %494 = vmatmul.mubr.msk.f32.vlgmr.msra.gmra.mrb[0].mxu1 %vm139_vm2, %v134_v35 }
 0x104   :  { %504 = vmatprep.mubr.msk.f32.mxu1 %vm585_vm0, %v586_v1  ;;  %541 = vmatpush3.bf16.msra.mxu1 %v540_v48 }
 0x105   :  { %542 = vmatprep.subr.bf16.mxu1 %v584_v0 }
 0x108   :  { %544 = vmatpush3.bf16.msra.mxu1 %v543_v51 }
 0x1d6   :  { %v209_v37 = vpop.f32.mrb[0].mxu1 }
 0x1d7   :  { %v210_v38 = vadd.f32 %v416_v36, %v209_v37  ;;  %v495_v39 = vpop.f32.mrb[1].mxu1 }
 0x1d9   :  { %v214_v40 = vsel %vm213_vm3, %v210_v38, 0.0 }
 0x1da   :  { %215 = vadd.xlane.f32.xlu0 %v214_v40 }
 0x267   :  { %v216_v41 = vpop.xlane.xlu0 %215 }
 0x268   :  { %v218_v42 = vmul.f32 0.03125, %v216_v41 }
 0x26a   :  { %v219_v43 = vsub.f32 %v210_v38, %v218_v42 }
 0x26c   :  { %v220_v44 = vmul.f32 %v219_v43, %v219_v43 }
 0x26e   :  { %v221_v45 = vsel %vm213_vm3, %v220_v44, 0.0 }
 0x26f   :  { %222 = vadd.xlane.f32.xlu0 %v221_v45 }
 0x2fc   :  { %v223_v52 = vpop.xlane.xlu0 %222 }
 0x2fd   :  { %v224_v53 = vmul.f32 0.03125, %v223_v52 }
 0x2ff   :  { %v225_v54 = vadd.f32 1e-05, %v224_v53 }
 0x301   :  { %551 = vrsqrt.f32 %v225_v54 }
 0x30b   :  { %v552_v55 = vpop.eup %551 }
 0x30c   :  { %v227_v56 = vmul.f32 %v552_v55, %v219_v43 }
 0x30e   :  { %505 = vmatmul.mubr.msk.f32.vlgmr.msra.gmra.mrb[2].mxu1 %vm213_vm3, %v227_v56 }
 0x3e1   :  { %v301_v59 = vpop.f32.mrb[2].mxu1 }
 0x3e2   :  { %v302_v60 = vadd.f32 %v418_v58, %v301_v59  ;;  %v506_v61 = vpop.f32.mrb[3].mxu1 }
 0x3e4   :  { %v307_v62 = vmul.f32 0.70710677, %v302_v60  ;;  %v305_v0 = vmul.f32 0.5, %v302_v60 }
 0x3e6   :  { %553 = verf.f32 %v307_v62 }
 0x3f0   :  { %v554_v63 = vpop.eup %553 }
 0x3f1   :  { %v309_v1 = vadd.f32 1.0, %v554_v63 }
 0x3f3   :  { %v310_v2 = vmul.f32 %v309_v1, %v305_v0 }
 0x3f5   :  { %510 = vmatmul.mubr.msk.f32.vlgmr.msra.gmra.mrb[2].mxu0 %vm315_vm4, %v310_v2 }
 0x4c8   :  { %v385_v4 = vpop.f32.mrb[2].mxu0 }
 0x4c9   :  { %v386_v5 = vadd.f32 %v420_v3, %v385_v4  ;;  %v511_v6 = vpop.f32.mrb[3].mxu0 }
 0x4cb   :  { %v390_v7 = vmul.f32 0.70710677, %v386_v5  ;;  %v389_v9 = vmul.f32 0.5, %v386_v5 }
 0x4cd   :  { %555 = verf.f32 %v390_v7 }
 0x4d7   :  { %v556_v8 = vpop.eup %555 }
 0x4d8   :  { %v392_v10 = vadd.f32 1.0, %v556_v8 }
 0x4da   :  { %v393_v12 = vmul.f32 %v392_v10, %v389_v9 }
 0x4dc   :  { %v398_v13 = vmul.f32 %v422_v11, %v393_v12 }
 0x4de   :  { %v400_v14 = vsel %vm399_vm5, %v398_v13, 0.0 }
 0x4df   :  { %401 = vadd.xlane.f32.xlu1 %v400_v14 }
 0x56c   :  { %v402_v16 = vpop.xlane.xlu1 %401 }
 0x56d   :  { %v407_v17 = vadd.f32 %v423_v15, %v402_v16 }
 0x56f   :  { %408 = vst [vmem:[%s646_s2] sm:$0xff] %v407_v17 }
 0x570   :  { %413 = vsyncpa [#allocation3], 1 }

</bundles_post_ra>
